<compile_context>
chip_gen: v6e
topology: v6e:2x2x1
jax: 0.10.0
libtpu: 0.0.40
codegen_flags: <defaults>
</compile_context>

<pallas_src>
import functools
import math

import jax
import jax.numpy as jnp
from jax.experimental import pallas as pl
from jax.experimental.pallas import tpu as pltpu


_LANES = 128                       # TPU lane width
_ROW_TILE_MAX = 8192               # packed rows per grid step (= 65536 docs at F=16)
_MIN_GRID_STEPS = 4                # keep >= 4 steps so v7x's 2 TCs stay busy
_VMEM_LIMIT_BYTES = 48 * 1024 * 1024   # < 64 MiB physical on v7x; plenty of headroom


def _round_up(x, m):
    return ((x + m - 1) // m) * m


def _ltr_kernel(x_ref, w1_ref, b1_ref, w2_ref, b2_ref, o_ref, *, compute_dtype):
    # x_ref : (row_tile, P*F)  lane-dense packed docs (P docs per row), streams from HBM
    # w1_ref: (P*F, P*W)       block-diagonal first-layer weight, VMEM-resident
    # b1_ref: (1, P*W)         first-layer bias tiled P times, VMEM-resident
    # w2_ref: (P*W, P)         block-structured second-layer weight, VMEM-resident
    # b2_ref: (1, 1)           second-layer bias, SMEM scalar
    # o_ref : (row_tile, P)    per-doc scores in document order
    x = x_ref[...].astype(compute_dtype)            # no-op cast when compute_dtype=f32
    w1 = w1_ref[...].astype(compute_dtype)
    h = jnp.dot(x, w1, preferred_element_type=jnp.float32)          # (rows, P*W) on MXU
    h = jnp.maximum(h + b1_ref[...].astype(jnp.float32), 0.0)       # bias + ReLU on VPU
    out = jnp.dot(h.astype(compute_dtype), w2_ref[...].astype(compute_dtype),
                  preferred_element_type=jnp.float32)               # (rows, P), no transpose
    o_ref[...] = (out + b2_ref[0, 0]).astype(o_ref.dtype)


@functools.partial(jax.jit, static_argnames=("compute_dtype",))
def ltr_forward(x, w1, b1, w2, b2, *, compute_dtype=jnp.float32):
    """LTRModel.forward: x (..., N, F) -> (..., N, 1).

    w1: (F, W), b1: (W,), w2: (W, 1), b2: (1,) — nn.Linear weights already stored
    in the (in, out) convention.
    """
    f = x.shape[-1]
    width = w1.shape[-1]
    lead = x.shape[:-1]
    total = math.prod(lead)

    # Docs packed per lane-dense row (8 for F=16).  The packing reshape is free
    # (contiguous) whenever `total` is a multiple of `pack`.
    pack = max(1, _LANES // f)
    row_width = pack * f

    x2d = x.reshape(total, f)
    pad_docs = (-total) % pack
    if pad_docs:
        # Copies only when B*N is not a multiple of the packing factor (<= 7 rows added).
        x2d = jnp.pad(x2d, ((0, pad_docs), (0, 0)))
    rows = (total + pad_docs) // pack
    x_packed = x2d.reshape(rows, row_width)

    # Block-diagonal / block-structured weights so P docs are scored per packed row.
    eye_p = jnp.eye(pack, dtype=jnp.float32)
    w1_big = jnp.kron(eye_p, w1.astype(jnp.float32))                      # (P*F, P*W)
    b1_big = jnp.tile(b1.reshape(1, width).astype(jnp.float32), (1, pack))  # (1, P*W)
    w2_big = jnp.kron(eye_p, w2.reshape(width, 1).astype(jnp.float32))    # (P*W, P)
    b2_2d = b2.reshape(1, 1).astype(jnp.float32)                          # SMEM scalar

    # Multi-MB streaming tiles, but keep >= _MIN_GRID_STEPS steps so "parallel"
    # can spread work across TensorCores.  Last (partial) block is handled by
    # Pallas padding/masking — no tile-multiple padding of x.
    row_tile = max(8, min(_ROW_TILE_MAX,
                          _round_up(pl.cdiv(rows, _MIN_GRID_STEPS), 8)))
    grid = (pl.cdiv(rows, row_tile),)

    out_packed = pl.pallas_call(
        functools.partial(_ltr_kernel, compute_dtype=compute_dtype),
        out_shape=jax.ShapeDtypeStruct((rows, pack), jnp.float32),
        grid=grid,
        in_specs=[
            pl.BlockSpec((row_tile, row_width), lambda i: (i, 0)),        # x stream
            pl.BlockSpec((row_width, pack * width), lambda i: (0, 0)),    # W1_big (resident)
            pl.BlockSpec((1, pack * width), lambda i: (0, 0)),            # b1_big (resident)
            pl.BlockSpec((pack * width, pack), lambda i: (0, 0)),         # W2_big (resident)
            pl.BlockSpec(memory_space=pltpu.MemorySpace.SMEM),            # b2 scalar
        ],
        out_specs=pl.BlockSpec((row_tile, pack), lambda i: (i, 0)),
        compiler_params=pltpu.CompilerParams(
            dimension_semantics=("parallel",),
            vmem_limit_bytes=_VMEM_LIMIT_BYTES,
        ),
    )(x_packed, w1_big, b1_big, w2_big, b2_2d)

    # Padded docs (relu(b1)·w2 + b2) are sliced off here before reshaping.
    out = out_packed.reshape(rows * pack)[:total]
    return out.reshape(*lead, 1)


def init_params(key, num_features, width):
    """Deterministic synthetic parameters matching the two nn.Linear layers
    (stored transposed to the (in, out) convention the kernel uses)."""
    k1, k2, k3, k4 = jax.random.split(key, 4)
    w1 = jax.random.normal(k1, (num_features, width), jnp.float32) * 0.1
    b1 = jax.random.normal(k2, (width,), jnp.float32) * 0.1
    w2 = jax.random.normal(k3, (width, 1), jnp.float32) * 0.1
    b2 = jax.random.normal(k4, (1,), jnp.float32) * 0.1
    return w1, b1, w2, b2


def _reference(x, w1, b1, w2, b2):
    h = jnp.maximum(
        jnp.einsum("...f,fw->...w", x, w1, precision=jax.lax.Precision.HIGHEST) + b1,
        0.0)
    return jnp.einsum("...w,wo->...o", h, w2,
                      precision=jax.lax.Precision.HIGHEST) + b2


if __name__ == "__main__":
    NUM_FEATURES = 16
    WIDTH = 32

    key = jax.random.PRNGKey(0)
    k_x1, k_x2, k_p = jax.random.split(key, 3)
    w1, b1, w2, b2 = init_params(k_p, NUM_FEATURES, WIDTH)

    # (1, N, F) exactly like the PyTorch module; N=10 exercises the <8-doc
    # remainder path and a single (partially-filled) grid step.
    x_small = jax.random.normal(k_x1, (1, 10, NUM_FEATURES), jnp.float32)
    out_small = jax.block_until_ready(ltr_forward(x_small, w1, b1, w2, b2))
    ref_small = _reference(x_small, w1, b1, w2, b2)
    assert out_small.shape == (1, 10, 1)
    assert jnp.allclose(out_small, ref_small, atol=5e-3, rtol=5e-3), float(
        jnp.max(jnp.abs(out_small - ref_small)))

    # Batched lists: 2x300 docs -> 600 docs -> 75 packed rows -> 4 grid steps of
    # 24 rows with a partial last tile (exercises batch flattening + masked tail).
    x_big = jax.random.normal(k_x2, (2, 300, NUM_FEATURES), jnp.float32)
    out_big = jax.block_until_ready(ltr_forward(x_big, w1, b1, w2, b2))
    ref_big = _reference(x_big, w1, b1, w2, b2)
    assert out_big.shape == (2, 300, 1)
    assert jnp.allclose(out_big, ref_big, atol=5e-3, rtol=5e-3), float(
        jnp.max(jnp.abs(out_big - ref_big)))

    print("KERNEL_OK")
</pallas_src>

<mosaic_0001>
module attributes {stable_mosaic.version = 11 : i64} {
  func.func @_ltr_kernel(%arg0: i32, %arg1: memref<8x128xf32, #tpu.memory_space<vmem>>, %arg2: memref<128x256xf32, #tpu.memory_space<vmem>>, %arg3: memref<1x256xf32, #tpu.memory_space<vmem>>, %arg4: memref<256x8xf32, #tpu.memory_space<vmem>>, %arg5: memref<1x1xf32, #tpu.memory_space<smem>>, %arg6: memref<8x8xf32, #tpu.memory_space<vmem>>) attributes {dimension_semantics = [#tpu.dimension_semantics<parallel>], iteration_bounds = array<i64: 1>, scalar_prefetch = 0 : i64, scratch_operands = 0 : i64, tpu.core_type = #tpu.core_type<tc>, window_params = [{transform_indices = @transform_0, window_bounds = array<i64: 8, 128>}, {pipeline_mode = #tpu.pipeline_mode<synchronous>, transform_indices = @transform_1, window_bounds = array<i64: 128, 256>}, {pipeline_mode = #tpu.pipeline_mode<synchronous>, transform_indices = @transform_2, window_bounds = array<i64: 1, 256>}, {pipeline_mode = #tpu.pipeline_mode<synchronous>, transform_indices = @transform_3, window_bounds = array<i64: 256, 8>}, {transform_indices = @transform_4, window_bounds = array<i64: 1, 1>}, {transform_indices = @transform_5, window_bounds = array<i64: 8, 8>}]} {
    %c0 = arith.constant 0 : index
    %c0_0 = arith.constant 0 : index
    %0 = vector.load %arg1[%c0, %c0_0] : memref<8x128xf32, #tpu.memory_space<vmem>>, vector<8x128xf32>
    %c0_1 = arith.constant 0 : index
    %c0_2 = arith.constant 0 : index
    %1 = vector.load %arg2[%c0_1, %c0_2] : memref<128x256xf32, #tpu.memory_space<vmem>>, vector<128x256xf32>
    %cst = arith.constant dense<0.000000e+00> : vector<8x256xf32>
    %2 = tpu.matmul %0, %1, %cst {dimension_numbers = #tpu.dot_dimension_numbers<[1], [0], [0], [1], [0, 0, 1, 1], [], []>} : vector<8x128xf32>, vector<128x256xf32>, vector<8x256xf32> -> vector<8x256xf32>
    %c0_3 = arith.constant 0 : index
    %c0_4 = arith.constant 0 : index
    %3 = vector.load %arg3[%c0_3, %c0_4] : memref<1x256xf32, #tpu.memory_space<vmem>>, vector<1x256xf32>
    %4 = vector.broadcast %3 : vector<1x256xf32> to vector<8x256xf32>
    %5 = arith.addf %2, %4 : vector<8x256xf32>
    %cst_5 = arith.constant 0.000000e+00 : f32
    %6 = vector.broadcast %cst_5 : f32 to vector<8x256xf32>
    %7 = arith.maximumf %5, %6 : vector<8x256xf32>
    %c0_6 = arith.constant 0 : index
    %c0_7 = arith.constant 0 : index
    %8 = vector.load %arg4[%c0_6, %c0_7] : memref<256x8xf32, #tpu.memory_space<vmem>>, vector<256x8xf32>
    %cst_8 = arith.constant dense<0.000000e+00> : vector<8x8xf32>
    %9 = tpu.matmul %7, %8, %cst_8 {dimension_numbers = #tpu.dot_dimension_numbers<[1], [0], [0], [1], [0, 0, 1, 1], [], []>} : vector<8x256xf32>, vector<256x8xf32>, vector<8x8xf32> -> vector<8x8xf32>
    %c0_9 = arith.constant 0 : index
    %c0_10 = arith.constant 0 : index
    %10 = memref.load %arg5[%c0_9, %c0_10] : memref<1x1xf32, #tpu.memory_space<smem>>
    %11 = vector.broadcast %10 : f32 to vector<8x8xf32>
    %12 = arith.addf %9, %11 : vector<8x8xf32>
    %c0_11 = arith.constant 0 : index
    %c0_12 = arith.constant 0 : index
    %13 = vector.load %arg6[%c0_11, %c0_12] : memref<8x8xf32, #tpu.memory_space<vmem>>, vector<8x8xf32>
    tpu.vector_store %arg6[%c0_11, %c0_12], %12 {strides = array<i32>} : memref<8x8xf32, #tpu.memory_space<vmem>>, vector<8x8xf32>,
    return
  }
  func.func @transform_0(%arg0: i32) -> (i32, i32) {
    %c0_i32 = arith.constant 0 : i32
    %c0_i32_0 = arith.constant 0 : i32
    return %arg0, %c0_i32 : i32, i32
  }
  func.func @transform_1(%arg0: i32) -> (i32, i32) {
    %c0_i32 = arith.constant 0 : i32
    %c0_i32_0 = arith.constant 0 : i32
    %c0_i32_1 = arith.constant 0 : i32
    return %c0_i32, %c0_i32_0 : i32, i32
  }
  func.func @transform_2(%arg0: i32) -> (i32, i32) {
    %c0_i32 = arith.constant 0 : i32
    %c0_i32_0 = arith.constant 0 : i32
    %c0_i32_1 = arith.constant 0 : i32
    return %c0_i32, %c0_i32_0 : i32, i32
  }
  func.func @transform_3(%arg0: i32) -> (i32, i32) {
    %c0_i32 = arith.constant 0 : i32
    %c0_i32_0 = arith.constant 0 : i32
    %c0_i32_1 = arith.constant 0 : i32
    return %c0_i32, %c0_i32_0 : i32, i32
  }
  func.func @transform_4(%arg0: i32) -> (i32, i32) {
    %c0_i32 = arith.constant 0 : i32
    %c0_i32_0 = arith.constant 0 : i32
    %c0_i32_1 = arith.constant 0 : i32
    return %c0_i32, %c0_i32_0 : i32, i32
  }
  func.func @transform_5(%arg0: i32) -> (i32, i32) {
    %c0_i32 = arith.constant 0 : i32
    %c0_i32_0 = arith.constant 0 : i32
    return %arg0, %c0_i32 : i32, i32
  }
}

</mosaic_0001>

<bundles_post_ra>
// kernel: ltr_forward.1
= control target key start
LH: loop header
LB: loop body
LE: loop exit
PB: predicated region body
PF: predicated region fallthrough
CT: control target
= control target key end

     0   :  { %v322_v4 = vmov 0.0   ;;  %vm243_vm0 = vcmask 64512   ;;  %s557_s0 = inlined_call_operand.vmem [shape: f32[2,128], index: 0, kind: input, shape index: {}]   ;;  %s558_s1 = inlined_call_operand.vmem [shape: f32[128,256], index: 1, kind: input, shape index: {}]   ;;  %s559_s2 = inlined_call_operand.vmem [shape: f32[1,256], index: 2, kind: input, shape index: {}]   ;;  %s560_s3 = inlined_call_operand.vmem [shape: f32[256,8], index: 3, kind: input, shape index: {}]   ;;  %s561_s4 = inlined_call_operand.<no memory space> [shape: f32[1,1], index: 4, kind: input, shape index: {}]   ;;  %s562_s5 = inlined_call_operand.vmem [shape: f32[2,8], index: 5, kind: output, shape index: {}]  }
   0x1   :  { %v53_v0 = vld [vmem:[%s558_s1 + $0xf8] sm:$0xff]  ;;  %v52_v1 = vld [vmem:[%s558_s1 + $0xf0] sm:$0xff]  ;;  %v51_v2 = vld [vmem:[%s558_s1 + $0xe8] sm:$0xff]  ;;  %130 = vmatprep.mubr.f32.mxu0 %v322_v4 }
   0x2   :  { %66 = vmatprep.subr.mxu0 %v53_v0  ;;  %v50_v3 = vld [vmem:[%s558_s1 + $0xe0] sm:$0xff]  ;;  %v49_v5 = vld [vmem:[%s558_s1 + $0xd8] sm:$0xff]  ;;  %v48_v6 = vld [vmem:[%s558_s1 + $0xd0] sm:$0xff] }
   0x3   :  { %67 = vmatpush1.msra.mxu0 %v52_v1  ;;  %v47_v7 = vld [vmem:[%s558_s1 + $0xc8] sm:$0xff]  ;;  %v46_v8 = vld [vmem:[%s558_s1 + $0xc0] sm:$0xff]  ;;  %v45_v9 = vld [vmem:[%s558_s1 + $0xb8] sm:$0xff] }
   0x4   :  { %68 = vmatprep.subr.mxu0 %v51_v2  ;;  %v44_v10 = vld [vmem:[%s558_s1 + $0xb0] sm:$0xff]  ;;  %v43_v11 = vld [vmem:[%s558_s1 + $0xa8] sm:$0xff]  ;;  %v42_v12 = vld [vmem:[%s558_s1 + $0xa0] sm:$0xff]  ;;  %v56_v2 = vlaneseq }
   0x5   :  { %69 = vmatpush1.msra.mxu0 %v50_v3  ;;  %v41_v13 = vld [vmem:[%s558_s1 + $0x98] sm:$0xff]  ;;  %v40_v14 = vld [vmem:[%s558_s1 + $0x90] sm:$0xff]  ;;  %v39_v18 = vld [vmem:[%s558_s1 + $0x88] sm:$0xff] }
   0x6   :  { %70 = vmatprep.subr.mxu0 %v49_v5  ;;  %v170_v15 = vld [vmem:[%s560_s3 + $0xf8] sm:$0xff]  ;;  %v169_v17 = vld [vmem:[%s560_s3 + $0xf0] sm:$0xff]  ;;  %v38_v20 = vld [vmem:[%s558_s1 + $0x80] sm:$0xff]  ;;  %v57_v3 = vshrl.u32 %v56_v2, 7 }
   0x7   :  { %71 = vmatpush1.msra.mxu0 %v48_v6  ;;  %v154_v16 = vld [vmem:[%s560_s3 + $0x78] sm:$0xff]  ;;  %286 = vmatprep.subr.mxu1 %v170_v15  ;;  %v153_v19 = vld [vmem:[%s560_s3 + $0x70] sm:$0xff]  ;;  %v168_v21 = vld [vmem:[%s560_s3 + $0xe8] sm:$0xff] }
   0x8   :  { %72 = vmatprep.subr.mxu0 %v47_v7  ;;  %287 = vmatpush3.msra.mxu1 %v154_v16  ;;  %v37_v22 = vld [vmem:[%s558_s1 + $0x78] sm:$0xff]  ;;  %v152_v23 = vld [vmem:[%s560_s3 + $0x68] sm:$0xff]  ;;  %v36_v24 = vld [vmem:[%s558_s1 + $0x70] sm:$0xff]  ;;  %v58_v4 = vsub.s32 0, %v57_v3  ;;  %v62_v6 = vsub.s32 1, %v57_v3  ;;  %v172_v16 = vstv %s561_s4 }
   0x9   :  { %73 = vmatpush1.msra.mxu0 %v46_v8  ;;  %288 = vmatprep.subr.mxu1 %v169_v17  ;;  %v167_v25 = vld [vmem:[%s560_s3 + $0xe0] sm:$0xff]  ;;  %v35_v26 = vld [vmem:[%s558_s1 + $0x68] sm:$0xff]  ;;  %v166_v29 = vld [vmem:[%s560_s3 + $0xd8] sm:$0xff] }
   0xa   :  { %74 = vmatprep.subr.mxu0 %v45_v9  ;;  %289 = vmatpush3.msra.mxu1 %v153_v19  ;;  %v151_v27 = vld [vmem:[%s560_s3 + $0x60] sm:$0xff]  ;;  %v33_v30 = vld [vmem:[%s558_s1 + $0x58] sm:$0xff]  ;;  %v32_v32 = vld [vmem:[%s558_s1 + $0x50] sm:$0xff] }
   0xb   :  { %75 = vmatpush1.msra.mxu0 %v44_v10  ;;  %290 = vmatprep.subr.mxu1 %v168_v21  ;;  %v34_v28 = vld [vmem:[%s558_s1 + $0x60] sm:$0xff]  ;;  %v150_v31 = vld [vmem:[%s560_s3 + $0x58] sm:$0xff]  ;;  %v165_v33 = vld [vmem:[%s560_s3 + $0xd0] sm:$0xff] }
   0xc   :  { %76 = vmatprep.subr.mxu0 %v43_v11  ;;  %291 = vmatpush3.msra.mxu1 %v152_v23  ;;  %v31_v34 = vld [vmem:[%s558_s1 + $0x48] sm:$0xff]  ;;  %v149_v35 = vld [vmem:[%s560_s3 + $0x50] sm:$0xff]  ;;  %v30_v36 = vld [vmem:[%s558_s1 + $0x40] sm:$0xff] }
   0xd   :  { %77 = vmatpush1.msra.mxu0 %v42_v12  ;;  %292 = vmatprep.subr.mxu1 %v167_v25  ;;  %v164_v37 = vld [vmem:[%s560_s3 + $0xc8] sm:$0xff]  ;;  %v29_v38 = vld [vmem:[%s558_s1 + $0x38] sm:$0xff]  ;;  %v28_v40 = vld [vmem:[%s558_s1 + $0x30] sm:$0xff] }
   0xe   :  { %78 = vmatprep.subr.mxu0 %v41_v13  ;;  %293 = vmatpush3.msra.mxu1 %v151_v27  ;;  %v148_v39 = vld [vmem:[%s560_s3 + $0x48] sm:$0xff]  ;;  %v163_v41 = vld [vmem:[%s560_s3 + $0xc0] sm:$0xff]  ;;  %v162_v45 = vld [vmem:[%s560_s3 + $0xb8] sm:$0xff] }
   0xf   :  { %79 = vmatpush1.msra.mxu0 %v40_v14  ;;  %294 = vmatprep.subr.mxu1 %v166_v29  ;;  %v27_v42 = vld [vmem:[%s558_s1 + $0x28] sm:$0xff]  ;;  %v147_v43 = vld [vmem:[%s560_s3 + $0x40] sm:$0xff]  ;;  %v25_v46 = vld [vmem:[%s558_s1 + $0x18] sm:$0xff] }
  0x10   :  { %80 = vmatprep.subr.mxu0 %v39_v18  ;;  %295 = vmatpush3.msra.mxu1 %v150_v31  ;;  %v26_v44 = vld [vmem:[%s558_s1 + $0x20] sm:$0xff]  ;;  %v146_v47 = vld [vmem:[%s560_s3 + $0x38] sm:$0xff]  ;;  %v24_v48 = vld [vmem:[%s558_s1 + $0x10] sm:$0xff] }
  0x11   :  { %81 = vmatpush1.msra.mxu0 %v38_v20  ;;  %296 = vmatprep.subr.mxu1 %v165_v33  ;;  %v161_v49 = vld [vmem:[%s560_s3 + $0xb0] sm:$0xff]  ;;  %v23_v50 = vld [vmem:[%s558_s1 + $0x8] sm:$0xff]  ;;  %v22_v52 = vld [vmem:[%s558_s1] sm:$0xff] }
  0x12   :  { %82 = vmatprep.subr.mxu0 %v37_v22  ;;  %297 = vmatpush3.msra.mxu1 %v149_v35  ;;  %v145_v51 = vld [vmem:[%s560_s3 + $0x30] sm:$0xff]  ;;  %v160_v53 = vld [vmem:[%s560_s3 + $0xa8] sm:$0xff]  ;;  %v21_v54 = vld [vmem:[%s557_s0] sm:$0xff] }
  0x13   :  { %83 = vmatpush1.msra.mxu0 %v36_v24  ;;  %298 = vmatprep.subr.mxu1 %v164_v37  ;;  %v144_v55 = vld [vmem:[%s560_s3 + $0x28] sm:$0xff]  ;;  %v159_v56 = vld [vmem:[%s560_s3 + $0xa0] sm:$0xff]  ;;  %v158_v58 = vld [vmem:[%s560_s3 + $0x98] sm:$0xff] }
  0x14   :  { %84 = vmatprep.subr.mxu0 %v35_v26  ;;  %299 = vmatpush3.msra.mxu1 %v148_v39  ;;  %v143_v57 = vld [vmem:[%s560_s3 + $0x20] sm:$0xff]  ;;  %v142_v59 = vld [vmem:[%s560_s3 + $0x18] sm:$0xff]  ;;  %v157_v60 = vld [vmem:[%s560_s3 + $0x90] sm:$0xff] }
  0x15   :  { %85 = vmatpush1.msra.mxu0 %v34_v28  ;;  %300 = vmatprep.subr.mxu1 %v163_v41  ;;  %v141_v61 = vld [vmem:[%s560_s3 + $0x10] sm:$0xff]  ;;  %v156_v62 = vld [vmem:[%s560_s3 + $0x88] sm:$0xff]  ;;  %v155_v0 = vld [vmem:[%s560_s3 + $0x80] sm:$0xff] }
  0x16   :  { %86 = vmatprep.subr.mxu0 %v33_v30  ;;  %301 = vmatpush3.msra.mxu1 %v147_v43  ;;  %v140_v63 = vld [vmem:[%s560_s3 + $0x8] sm:$0xff]  ;;  %v139_v1 = vld [vmem:[%s560_s3] sm:$0xff] }
  0x17   :  { %87 = vmatpush1.msra.mxu0 %v32_v32  ;;  %302 = vmatprep.subr.mxu1 %v162_v45  ;;  %v54_v5 = vld [vmem:[%s559_s2] sm:$0x3] }
  0x18   :  { %88 = vmatprep.subr.mxu0 %v31_v34  ;;  %303 = vmatpush3.msra.mxu1 %v146_v47  ;;  %v59_v7 = vrot.slane %v54_v5, %v58_v4  ;;  %v63_v8 = vrot.slane %v54_v5, %v62_v6 }
  0x19   :  { %89 = vmatpush1.msra.mxu0 %v30_v36  ;;  %304 = vmatprep.subr.mxu1 %v161_v49 }
  0x1a   :  { %90 = vmatprep.subr.mxu0 %v29_v38  ;;  %305 = vmatpush3.msra.mxu1 %v145_v51 }
  0x1b   :  { %91 = vmatpush1.msra.mxu0 %v28_v40  ;;  %306 = vmatprep.subr.mxu1 %v160_v53 }
  0x1c   :  { %92 = vmatprep.subr.mxu0 %v27_v42  ;;  %307 = vmatpush3.msra.mxu1 %v144_v55 }
  0x1d   :  { %93 = vmatpush1.msra.mxu0 %v26_v44  ;;  %308 = vmatprep.subr.mxu1 %v159_v56 }
  0x1e   :  { %94 = vmatprep.subr.mxu0 %v25_v46  ;;  %309 = vmatpush3.msra.mxu1 %v143_v57 }
  0x1f   :  { %95 = vmatpush1.msra.mxu0 %v24_v48  ;;  %310 = vmatprep.subr.mxu1 %v158_v58 }
  0x20   :  { %96 = vmatprep.subr.mxu0 %v23_v50  ;;  %311 = vmatpush3.msra.mxu1 %v142_v59 }
  0x21   :  { %97 = vmatpush1.msra.mxu0 %v22_v52  ;;  %312 = vmatprep.subr.mxu1 %v157_v60 }
  0x22   :  { %131 = vmatmul.mubr.f32.vlgmr.msra.gmra.mxu0 %v21_v54  ;;  %313 = vmatpush3.msra.mxu1 %v141_v61 }
  0x23   :  { %314 = vmatprep.subr.mxu1 %v156_v62 }
  0x24   :  { %315 = vmatpush3.msra.mxu1 %v140_v63 }
  0x25   :  { %316 = vmatprep.subr.mxu1 %v155_v0 }
  0x26   :  { %317 = vmatpush3.msra.mxu1 %v139_v1 }
  0xe2   :  { %v132_v9 = vpop.f32.mrf.mxu0 }
  0xe3   :  { %v133_v10 = vadd.f32 %v132_v9, %v59_v7 }
  0xe4   :  { %v134_v11 = vpop.f32.mrf.mxu0 }
  0xe5   :  { %v135_v12 = vadd.f32 %v134_v11, %v63_v8  ;;  %v137_v14 = vmax.f32 %v133_v10, 0.0 }
  0xe7   :  { %v138_v13 = vmax.f32 %v135_v12, 0.0 }
  0xe9   :  { %237 = vmatprep.mubr.f32.mxu1 %v138_v13 }
  0xea   :  { %238 = vmatmul.mubr.f32.vlgmr.msra.gmra.mxu1 %v137_v14 }
 0x1aa   :  { %v318_v15 = vpop.f32.mrf.mxu1 }
 0x1ac   :  { %v319_v17 = vpop.f32.mrf.mxu1 }
 0x1ad   :  { %v320_v18 = vadd.f32 %v319_v17, %v318_v15 }
 0x1af   :  { %v240_v19 = vadd.f32 %v320_v18, %v172_v16 }
 0x1b1   :  { %244 = vst.msk [vmem:[#allocation3] sm:$0xff] %vm243_vm0, %v240_v19 }
 0x1b8   :  { %v263_v20 = vld [vmem:[#allocation3] sm:$0x3] }
 0x1b9   :  { %264 = vst [vmem:[%s562_s5] sm:$0x3] %v263_v20 }

</bundles_post_ra>
